<compile_context>
chip_gen: v5e
topology: v5e:2x2
jax: 0.10.0
libtpu: 0.0.40
codegen_flags: <defaults>
</compile_context>

<pallas_src>
import functools

import jax
import jax.numpy as jnp
from jax.experimental import pallas as pl
from jax.experimental.pallas import tpu as pltpu

_LANE = 128


def _round_up(n, m):
    return ((n + m - 1) // m) * m


def _vmem_capacity_bytes():
    try:
        return int(pltpu.get_tpu_info().vmem_capacity_bytes)
    except Exception:
        return 64 * 1024 * 1024  # conservative: v7x per-core VMEM


def downstream_kernel(x_ref, we_ref, be_ref, wh_ref, bh_ref, o_ref, *, f_chunk):
    """Fused frozen-encoder (Linear+ReLU) + linear head for one batch tile.

    The feature dimension is processed in f_chunk-wide column chunks so the
    live f32 `feat` tile stays small (less vreg/VMEM spill, overlaps the head
    matmul of chunk k with the encoder matmul of chunk k+1).
    """
    x_bf = x_ref[...].astype(we_ref.dtype)          # VPU cast, f32 -> bf16
    tb = x_ref.shape[0]
    F_p = we_ref.shape[1]
    C_p = wh_ref.shape[1]

    acc = jnp.zeros((tb, C_p), jnp.float32)
    for f0 in range(0, F_p, f_chunk):               # static slices: zero-cost views
        # Frozen encoder: MXU (bf16 in / f32 acc) + bias + ReLU in f32.
        feat = jnp.dot(x_bf, we_ref[:, f0:f0 + f_chunk],
                       preferred_element_type=jnp.float32)
        feat = jnp.maximum(feat + be_ref[:, f0:f0 + f_chunk], 0.0)
        # Trainable head contribution of this feature chunk.
        acc = acc + jnp.dot(feat.astype(wh_ref.dtype),
                            wh_ref[f0:f0 + f_chunk, :],
                            preferred_element_type=jnp.float32)

    o_ref[...] = (acc + bh_ref[...]).astype(o_ref.dtype)


def prepare_downstream_params(w_enc, b_enc, w_head, b_head, *,
                              compute_dtype=jnp.bfloat16):
    """One-time padding/casting of the (frozen) parameters.

    w_enc:  [D_in, F]  frozen encoder weight (torch weight.T layout)
    b_enc:  [F]        frozen encoder bias
    w_head: [F, C]     head weight (torch weight.T layout)
    b_head: [C]        head bias

    Padded feature/class columns are exact zeros, so they never change the
    math; padded logits columns are sliced off in downstream_forward.
    """
    D_in, F = w_enc.shape
    F2, C = w_head.shape
    assert F2 == F, "encoder n_features must match head in_features"

    F_p = _round_up(F, _LANE)
    C_p = _round_up(C, _LANE)

    we_p = jnp.zeros((D_in, F_p), compute_dtype).at[:, :F].set(
        w_enc.astype(compute_dtype))
    wh_p = jnp.zeros((F_p, C_p), compute_dtype).at[:F, :C].set(
        w_head.astype(compute_dtype))
    be_p = jnp.zeros((1, F_p), jnp.float32).at[0, :F].set(
        b_enc.astype(jnp.float32))
    bh_p = jnp.zeros((1, C_p), jnp.float32).at[0, :C].set(
        b_head.astype(jnp.float32))

    return {"we": we_p, "be": be_p, "wh": wh_p, "bh": bh_p, "n_classes": C}


def downstream_forward(x, params, *, tile_b=512):
    """DownStream forward: head(encoder(x)).  Returns [B, n_classes] f32 logits.

    NOTE: x and both weight matrices go through the MXU as bf16 with f32
    accumulation -- an intentional precision change vs. the f32 PyTorch
    reference (inference-grade).
    """
    B, D_in = x.shape
    we_p, be_p, wh_p, bh_p = params["we"], params["be"], params["wh"], params["bh"]
    C = params["n_classes"]
    assert we_p.shape[0] == D_in, "x feature dim must match encoder weight"
    F_p = we_p.shape[1]
    C_p = wh_p.shape[1]

    # bf16 packs 2 rows per sublane -> multiple-of-16 batch tiles keep vregs
    # fully packed.  Last grid block may be ragged (masked output writeback).
    tile_b = max(16, _round_up(min(tile_b, _round_up(B, 16)), 16))
    grid = (pl.cdiv(B, tile_b),)
    b_eff = grid[0] * tile_b

    # Feature-chunk width for the in-kernel epilogue loop (F_p is always a
    # multiple of 128, so 128 always divides).
    f_chunk = 256 if F_p % 256 == 0 else 128

    w_itemsize = jnp.dtype(we_p.dtype).itemsize
    x_itemsize = jnp.dtype(x.dtype).itemsize

    cost = pl.CostEstimate(
        flops=2 * b_eff * (D_in * F_p + F_p * C_p),
        transcendentals=0,
        bytes_accessed=(B * D_in * x_itemsize
                        + (we_p.size + wh_p.size) * w_itemsize
                        + (be_p.size + bh_p.size) * 4
                        + B * C_p * 4),
    )

    # VMEM budget: single-buffered resident weights + double-buffered x/out
    # tiles + epilogue scratch, clamped to this generation's capacity
    # (per-TensorCore on v7x: each core holds its own weight copy).
    resident = ((we_p.size + wh_p.size) * w_itemsize
                + (be_p.size + bh_p.size) * 4
                + 2 * tile_b * D_in * x_itemsize
                + 2 * tile_b * C_p * 4
                + tile_b * (f_chunk + 2 * C_p) * 4)
    vmem_limit = int(min(0.85 * _vmem_capacity_bytes(),
                         max(32 << 20, resident * 1.25 + (2 << 20))))

    kernel = functools.partial(downstream_kernel, f_chunk=f_chunk)

    out = pl.pallas_call(
        kernel,
        out_shape=jax.ShapeDtypeStruct((B, C_p), jnp.float32),
        grid_spec=pltpu.PrefetchScalarGridSpec(
            num_scalar_prefetch=0,
            grid=grid,
            in_specs=[
                # x batch tile: full-extent D block (no D padding copy needed),
                # default double-buffering for DMA/compute overlap.
                pl.BlockSpec((tile_b, D_in), lambda i: (i, 0)),
                # Constant index maps: fetched once, VMEM-resident across all
                # batch tiles; single-buffered to halve resident-weight VMEM.
                pl.BlockSpec((D_in, F_p), lambda i: (0, 0),
                             pipeline_mode=pl.Buffered(1)),   # encoder W
                pl.BlockSpec((1, F_p), lambda i: (0, 0),
                             pipeline_mode=pl.Buffered(1)),   # encoder b
                pl.BlockSpec((F_p, C_p), lambda i: (0, 0),
                             pipeline_mode=pl.Buffered(1)),   # head W
                pl.BlockSpec((1, C_p), lambda i: (0, 0),
                             pipeline_mode=pl.Buffered(1)),   # head b
            ],
            out_specs=pl.BlockSpec((tile_b, C_p), lambda i: (i, 0)),
        ),
        compiler_params=pltpu.CompilerParams(
            dimension_semantics=("parallel",),    # megacore-shard batch tiles
            vmem_limit_bytes=vmem_limit,
        ),
        cost_estimate=cost,
    )(x, we_p, be_p, wh_p, bh_p)

    # Drop the zero-padded class columns (lane padding only).
    return out[:, :C]


if __name__ == "__main__":
    # Small deterministic shapes; deliberately NOT tile/lane aligned so the
    # ragged-batch path and F/C lane padding are exercised.
    B = 200          # not a multiple of 16 -> ragged last batch tile
    D_IN = 96        # full-extent D block (no 128 alignment required)
    N_FEATURES = 160 # -> padded to 256 feature columns
    N_CLASSES = 10   # -> padded to 128 class columns (lane-dense stores)

    key = jax.random.PRNGKey(0)
    k_x, k_we, k_be, k_wh, k_bh = jax.random.split(key, 5)

    x = jax.random.normal(k_x, (B, D_IN), dtype=jnp.float32)

    # Frozen encoder params (deterministic init).
    # TODO(synk): the real encoder architecture is injected externally; modeled
    # here as a single frozen Linear+ReLU producing n_features.
    w_enc = jax.random.normal(k_we, (D_IN, N_FEATURES), dtype=jnp.float32) * 0.1
    b_enc = jax.random.normal(k_be, (N_FEATURES,), dtype=jnp.float32) * 0.01

    # Trainable head params: nn.Linear(n_features, n_classes), stored as [F, C]
    # (i.e. PyTorch weight.T) so the kernel computes feat @ Wh.
    w_head = jax.random.normal(k_wh, (N_FEATURES, N_CLASSES), dtype=jnp.float32) * 0.1
    b_head = jax.random.normal(k_bh, (N_CLASSES,), dtype=jnp.float32) * 0.01

    # One-time parameter padding/casting (hoisted out of the per-call path).
    params = prepare_downstream_params(w_enc, b_enc, w_head, b_head)

    out = downstream_forward(x, params)
    out = jax.block_until_ready(out)
    assert out.shape == (B, N_CLASSES)

    # Plain-JAX reference with the same bf16-MXU / f32-accumulate math.
    bf = jnp.bfloat16
    feat_ref = jnp.maximum(
        jnp.dot(x.astype(bf), w_enc.astype(bf),
                preferred_element_type=jnp.float32) + b_enc[None, :], 0.0)
    ref = jnp.dot(feat_ref.astype(bf), w_head.astype(bf),
                  preferred_element_type=jnp.float32) + b_head[None, :]
    assert jnp.allclose(out, ref, atol=2e-3, rtol=2e-3), \
        float(jnp.max(jnp.abs(out - ref)))

    print("KERNEL_OK")
</pallas_src>

<mosaic_0001>
module attributes {stable_mosaic.version = 11 : i64} {
  func.func @downstream_kernel(%arg0: i32, %arg1: memref<208x96xf32, #tpu.memory_space<vmem>>, %arg2: memref<96x256xbf16, #tpu.memory_space<vmem>>, %arg3: memref<1x256xf32, #tpu.memory_space<vmem>>, %arg4: memref<256x128xbf16, #tpu.memory_space<vmem>>, %arg5: memref<1x128xf32, #tpu.memory_space<vmem>>, %arg6: memref<208x128xf32, #tpu.memory_space<vmem>>) attributes {dimension_semantics = [#tpu.dimension_semantics<parallel>], iteration_bounds = array<i64: 1>, scalar_prefetch = 0 : i64, scratch_operands = 0 : i64, tpu.core_type = #tpu.core_type<tc>, window_params = [{transform_indices = @transform_0, window_bounds = array<i64: 208, 96>}, {pipeline_mode = #tpu.pipeline_mode<synchronous>, transform_indices = @transform_1, window_bounds = array<i64: 96, 256>}, {pipeline_mode = #tpu.pipeline_mode<synchronous>, transform_indices = @transform_2, window_bounds = array<i64: 1, 256>}, {pipeline_mode = #tpu.pipeline_mode<synchronous>, transform_indices = @transform_3, window_bounds = array<i64: 256, 128>}, {pipeline_mode = #tpu.pipeline_mode<synchronous>, transform_indices = @transform_4, window_bounds = array<i64: 1, 128>}, {transform_indices = @transform_5, window_bounds = array<i64: 208, 128>}]} {
    %c0 = arith.constant 0 : index
    %c0_0 = arith.constant 0 : index
    %0 = vector.load %arg1[%c0, %c0_0] : memref<208x96xf32, #tpu.memory_space<vmem>>, vector<208x96xf32>
    %1 = arith.truncf %0 : vector<208x96xf32> to vector<208x96xbf16>
    %cst = arith.constant 0.000000e+00 : f32
    %2 = vector.broadcast %cst : f32 to vector<208x128xf32>
    %c0_1 = arith.constant 0 : index
    %c0_2 = arith.constant 0 : index
    %3 = vector.load %arg2[%c0_1, %c0_2] : memref<96x256xbf16, #tpu.memory_space<vmem>>, vector<96x256xbf16>
    %cst_3 = arith.constant dense<0.000000e+00> : vector<208x256xf32>
    %4 = tpu.matmul %1, %3, %cst_3 {dimension_numbers = #tpu.dot_dimension_numbers<[1], [0], [0], [1], [0, 0, 1, 1], [], []>} : vector<208x96xbf16>, vector<96x256xbf16>, vector<208x256xf32> -> vector<208x256xf32>
    %c0_4 = arith.constant 0 : index
    %c0_5 = arith.constant 0 : index
    %5 = vector.load %arg3[%c0_4, %c0_5] : memref<1x256xf32, #tpu.memory_space<vmem>>, vector<1x256xf32>
    %6 = vector.broadcast %5 : vector<1x256xf32> to vector<208x256xf32>
    %7 = arith.addf %4, %6 : vector<208x256xf32>
    %cst_6 = arith.constant 0.000000e+00 : f32
    %8 = vector.broadcast %cst_6 : f32 to vector<208x256xf32>
    %9 = arith.maximumf %7, %8 : vector<208x256xf32>
    %10 = arith.truncf %9 : vector<208x256xf32> to vector<208x256xbf16>
    %c0_7 = arith.constant 0 : index
    %c0_8 = arith.constant 0 : index
    %11 = vector.load %arg4[%c0_7, %c0_8] : memref<256x128xbf16, #tpu.memory_space<vmem>>, vector<256x128xbf16>
    %cst_9 = arith.constant dense<0.000000e+00> : vector<208x128xf32>
    %12 = tpu.matmul %10, %11, %cst_9 {dimension_numbers = #tpu.dot_dimension_numbers<[1], [0], [0], [1], [0, 0, 1, 1], [], []>} : vector<208x256xbf16>, vector<256x128xbf16>, vector<208x128xf32> -> vector<208x128xf32>
    %13 = arith.addf %2, %12 : vector<208x128xf32>
    %c0_10 = arith.constant 0 : index
    %c0_11 = arith.constant 0 : index
    %14 = vector.load %arg5[%c0_10, %c0_11] : memref<1x128xf32, #tpu.memory_space<vmem>>, vector<1x128xf32>
    %15 = vector.broadcast %14 : vector<1x128xf32> to vector<208x128xf32>
    %16 = arith.addf %13, %15 : vector<208x128xf32>
    %c0_12 = arith.constant 0 : index
    %c0_13 = arith.constant 0 : index
    %17 = vector.load %arg6[%c0_12, %c0_13] : memref<208x128xf32, #tpu.memory_space<vmem>>, vector<208x128xf32>
    tpu.vector_store %arg6[%c0_12, %c0_13], %16 {strides = array<i32>} : memref<208x128xf32, #tpu.memory_space<vmem>>, vector<208x128xf32>,
    return
  }
  func.func @transform_0(%arg0: i32) -> (i32, i32) {
    %c0_i32 = arith.constant 0 : i32
    %c0_i32_0 = arith.constant 0 : i32
    return %arg0, %c0_i32 : i32, i32
  }
  func.func @transform_1(%arg0: i32) -> (i32, i32) {
    %c0_i32 = arith.constant 0 : i32
    %c0_i32_0 = arith.constant 0 : i32
    %c0_i32_1 = arith.constant 0 : i32
    return %c0_i32, %c0_i32_0 : i32, i32
  }
  func.func @transform_2(%arg0: i32) -> (i32, i32) {
    %c0_i32 = arith.constant 0 : i32
    %c0_i32_0 = arith.constant 0 : i32
    %c0_i32_1 = arith.constant 0 : i32
    return %c0_i32, %c0_i32_0 : i32, i32
  }
  func.func @transform_3(%arg0: i32) -> (i32, i32) {
    %c0_i32 = arith.constant 0 : i32
    %c0_i32_0 = arith.constant 0 : i32
    %c0_i32_1 = arith.constant 0 : i32
    return %c0_i32, %c0_i32_0 : i32, i32
  }
  func.func @transform_4(%arg0: i32) -> (i32, i32) {
    %c0_i32 = arith.constant 0 : i32
    %c0_i32_0 = arith.constant 0 : i32
    %c0_i32_1 = arith.constant 0 : i32
    return %c0_i32, %c0_i32_0 : i32, i32
  }
  func.func @transform_5(%arg0: i32) -> (i32, i32) {
    %c0_i32 = arith.constant 0 : i32
    %c0_i32_0 = arith.constant 0 : i32
    return %arg0, %c0_i32 : i32, i32
  }
}

</mosaic_0001>

<bundles_post_ra>
// kernel: tpu_custom_call.1
= control target key start
LH: loop header
LB: loop body
LE: loop exit
PB: predicated region body
PF: predicated region fallthrough
CT: control target
= control target key end

     0   :  { %10 = vsyncpa [#allocation3], 0  ;;  %vm139_vm0 = vcmask 785408   ;;  %s1275_s0 = inlined_call_operand.vmem [shape: f32[200,96], index: 0, kind: input, shape index: {}]   ;;  %s1276_s1 = inlined_call_operand.vmem [shape: bf16[96,256], index: 1, kind: input, shape index: {}]   ;;  %s1277_s2 = inlined_call_operand.vmem [shape: f32[1,256], index: 2, kind: input, shape index: {}]   ;;  %s1278_s3 = inlined_call_operand.vmem [shape: bf16[256,128], index: 3, kind: input, shape index: {}]   ;;  %s1279_s4 = inlined_call_operand.vmem [shape: f32[1,128], index: 4, kind: input, shape index: {}]   ;;  %s1280_s5 = inlined_call_operand.hbm [shape: f32[200,128], index: 5, kind: output, shape index: {}]  }
   0x1   :  { %v771_v0 = vld [vmem:[%s1276_s1 + $0x50] sm:$0xf]  ;;  %v878_v1 = vld [vmem:[%s1276_s1 + $0x54] sm:$0xf0]  ;;  %v877_v3 = vld [vmem:[%s1276_s1 + $0x54] sm:$0xf] }
   0x2   :  { %v772_v2 = vor.u32 %v878_v1, %v771_v0  ;;  %v773_v4 = vld [vmem:[%s1276_s1 + $0x58] sm:$0xf0]  ;;  %v763_v5 = vld [vmem:[%s1276_s1 + $0x40] sm:$0xf]  ;;  %v876_v7 = vld [vmem:[%s1276_s1 + $0x44] sm:$0xf0] }
   0x3   :  { %v776_v6 = vor.u32 %v877_v3, %v773_v4  ;;  %v875_v8 = vld [vmem:[%s1276_s1 + $0x44] sm:$0xf]  ;;  %v765_v9 = vld [vmem:[%s1276_s1 + $0x48] sm:$0xf0]  ;;  %v764_v10 = vor.u32 %v876_v7, %v763_v5  ;;  %v755_v12 = vld [vmem:[%s1276_s1 + $0x30] sm:$0xf] }
   0x4   :  { %181 = vmatpush.bf16.msra.mxu0 %v772_v2  ;;  %v768_v11 = vor.u32 %v875_v8, %v765_v9  ;;  %v874_v13 = vld [vmem:[%s1276_s1 + $0x34] sm:$0xf0]  ;;  %v873_v14 = vld [vmem:[%s1276_s1 + $0x34] sm:$0xf]  ;;  %v757_v15 = vld [vmem:[%s1276_s1 + $0x38] sm:$0xf0] }
   0x5   :  { %255 = vmatpush.bf16.msra.mxu1 %v776_v6  ;;  %v756_v16 = vor.u32 %v874_v13, %v755_v12  ;;  %v760_v17 = vor.u32 %v873_v14, %v757_v15  ;;  %v747_v18 = vld [vmem:[%s1276_s1 + $0x20] sm:$0xf]  ;;  %v872_v19 = vld [vmem:[%s1276_s1 + $0x24] sm:$0xf0]  ;;  %v871_v20 = vld [vmem:[%s1276_s1 + $0x24] sm:$0xf] }
   0x6   :  { %v749_v21 = vld [vmem:[%s1276_s1 + $0x28] sm:$0xf0]  ;;  %v748_v22 = vor.u32 %v872_v19, %v747_v18  ;;  %v739_v24 = vld [vmem:[%s1276_s1 + $0x10] sm:$0xf]  ;;  %v870_v25 = vld [vmem:[%s1276_s1 + $0x14] sm:$0xf0] }
   0x7   :  { %v752_v23 = vor.u32 %v871_v20, %v749_v21  ;;  %v869_v26 = vld [vmem:[%s1276_s1 + $0x14] sm:$0xf]  ;;  %v741_v27 = vld [vmem:[%s1276_s1 + $0x18] sm:$0xf0]  ;;  %v740_v28 = vor.u32 %v870_v25, %v739_v24  ;;  %v731_v30 = vld [vmem:[%s1276_s1] sm:$0xf] }
   0x8   :  { %182 = vmatpush.bf16.msra.mxu0 %v764_v10  ;;  %v744_v29 = vor.u32 %v869_v26, %v741_v27  ;;  %v868_v31 = vld [vmem:[%s1276_s1 + $0x4] sm:$0xf0]  ;;  %v867_v32 = vld [vmem:[%s1276_s1 + $0x4] sm:$0xf]  ;;  %v733_v33 = vld [vmem:[%s1276_s1 + $0x8] sm:$0xf0] }
   0x9   :  { %256 = vmatpush.bf16.msra.mxu1 %v768_v11  ;;  %v732_v34 = vor.u32 %v868_v31, %v731_v30  ;;  %v22_v35 = vld [vmem:[%s1275_s0] sm:$0xff]  ;;  %v23_v36 = vld [vmem:[%s1275_s0 + $0x8] sm:$0xff]  ;;  %v736_v37 = vor.u32 %v867_v32, %v733_v33  ;;  %v24_v39 = vld [vmem:[%s1275_s0 + $0x10] sm:$0xff] }
   0xa   :  { %v48_v38 = vpack.c.bf16 %v23_v36, %v22_v35  ;;  %v25_v40 = vld [vmem:[%s1275_s0 + $0x18] sm:$0xff]  ;;  %v26_v42 = vld [vmem:[%s1275_s0 + $0x20] sm:$0xff]  ;;  %v27_v43 = vld [vmem:[%s1275_s0 + $0x28] sm:$0xff] }
   0xb   :  { %v49_v41 = vpack.c.bf16 %v25_v40, %v24_v39  ;;  %v50_v44 = vpack.c.bf16 %v27_v43, %v26_v42  ;;  %v28_v45 = vld [vmem:[%s1275_s0 + $0x30] sm:$0xff]  ;;  %v29_v46 = vld [vmem:[%s1275_s0 + $0x38] sm:$0xff]  ;;  %v30_v48 = vld [vmem:[%s1275_s0 + $0x40] sm:$0xff] }
   0xc   :  { %183 = vmatpush.bf16.msra.mxu0 %v756_v16  ;;  %v51_v47 = vpack.c.bf16 %v29_v46, %v28_v45  ;;  %v31_v49 = vld [vmem:[%s1275_s0 + $0x48] sm:$0xff]  ;;  %v886_v51 = vld [vmem:[%s1278_s3 + $0x38] sm:$0xff]  ;;  %v32_v53 = vld [vmem:[%s1275_s0 + $0x50] sm:$0xff] }
   0xd   :  { %257 = vmatpush.bf16.msra.mxu1 %v760_v17  ;;  %v52_v50 = vpack.c.bf16 %v31_v49, %v30_v48  ;;  %v894_v52 = vld [vmem:[%s1278_s3 + $0x78] sm:$0xff]  ;;  %537 = vmatpush.bf16.msra.mxu2 %v886_v51  ;;  %v885_v56 = vld [vmem:[%s1278_s3 + $0x30] sm:$0xff]  ;;  %v884_v58 = vld [vmem:[%s1278_s3 + $0x28] sm:$0xff] }
   0xe   :  { %611 = vmatpush.bf16.msra.mxu3 %v894_v52  ;;  %v33_v54 = vld [vmem:[%s1275_s0 + $0x58] sm:$0xff]  ;;  %v893_v57 = vld [vmem:[%s1278_s3 + $0x70] sm:$0xff]  ;;  %v892_v59 = vld [vmem:[%s1278_s3 + $0x68] sm:$0xff] }
   0xf   :  { %v53_v55 = vpack.c.bf16 %v33_v54, %v32_v53  ;;  %v883_v60 = vld [vmem:[%s1278_s3 + $0x20] sm:$0xff]  ;;  %v35_v63 = vld [vmem:[%s1275_s0 + $0x68] sm:$0xff]  ;;  %v882_v1 = vld [vmem:[%s1278_s3 + $0x18] sm:$0xff] }
  0x10   :  { %184 = vmatpush.bf16.msra.mxu0 %v748_v22  ;;  %v891_v61 = vld [vmem:[%s1278_s3 + $0x60] sm:$0xff]  ;;  %v890_v2 = vld [vmem:[%s1278_s3 + $0x58] sm:$0xff]  ;;  %v881_v3 = vld [vmem:[%s1278_s3 + $0x10] sm:$0xff] }
  0x11   :  { %258 = vmatpush.bf16.msra.mxu1 %v752_v23  ;;  %538 = vmatpush.bf16.msra.mxu2 %v885_v56  ;;  %v34_v62 = vld [vmem:[%s1275_s0 + $0x60] sm:$0xff]  ;;  %v889_v4 = vld [vmem:[%s1278_s3 + $0x50] sm:$0xff]  ;;  %v880_v5 = vld [vmem:[%s1278_s3 + $0x8] sm:$0xff] }
  0x12   :  { %612 = vmatpush.bf16.msra.mxu3 %v893_v57  ;;  %v54_v0 = vpack.c.bf16 %v35_v63, %v34_v62  ;;  %v888_v6 = vld [vmem:[%s1278_s3 + $0x48] sm:$0xff]  ;;  %v879_v7 = vld [vmem:[%s1278_s3] sm:$0xff]  ;;  %v36_v9 = vld [vmem:[%s1275_s0 + $0x70] sm:$0xff] }
  0x13   :  { %v887_v8 = vld [vmem:[%s1278_s3 + $0x40] sm:$0xff]  ;;  %v37_v10 = vld [vmem:[%s1275_s0 + $0x78] sm:$0xff]  ;;  %v39_v13 = vld [vmem:[%s1275_s0 + $0x88] sm:$0xff] }
  0x14   :  { %185 = vmatpush.bf16.msra.mxu0 %v740_v28  ;;  %v55_v11 = vpack.c.bf16 %v37_v10, %v36_v9  ;;  %v38_v12 = vld [vmem:[%s1275_s0 + $0x80] sm:$0xff]  ;;  %v40_v30 = vld [vmem:[%s1275_s0 + $0x90] sm:$0xff]  ;;  %v41_v31 = vld [vmem:[%s1275_s0 + $0x98] sm:$0xff] }
  0x15   :  { %259 = vmatpush.bf16.msra.mxu1 %v744_v29  ;;  %539 = vmatpush.bf16.msra.mxu2 %v884_v58  ;;  %v56_v14 = vpack.c.bf16 %v39_v13, %v38_v12  ;;  %v73_v15 = vld [vmem:[%s1277_s2] sm:$0x3]  ;;  %v43_v48 = vld [vmem:[%s1275_s0 + $0xa8] sm:$0xff] }
  0x16   :  { %613 = vmatpush.bf16.msra.mxu3 %v892_v59  ;;  %v1151_v18 = vperm.slane %v73_v15, 0  ;;  %v1154_v19 = vperm.slane %v73_v15, 1 }
  0x18   :  { %186 = vmatpush.bf16.msra.mxu0 %v732_v34  ;;  %v57_v34 = vpack.c.bf16 %v41_v31, %v40_v30 }
  0x19   :  { %260 = vmatpush.bf16.msra.mxu1 %v736_v37  ;;  %540 = vmatpush.bf16.msra.mxu2 %v883_v60 }
  0x1a   :  { %614 = vmatpush.bf16.msra.mxu3 %v891_v61 }
  0x1b   :  { %777 = vmatmul.msk.bf16.vlgmr.msra.gmra.mxu0 %vm139_vm0, %v48_v38 }
  0x1c   :  { %790 = vmatmul.msk.bf16.vlgmr.msra.gmra.mxu1 %vm139_vm0, %v48_v38 }
  0x1d   :  { %541 = vmatpush.bf16.msra.mxu2 %v882_v1  ;;  %v45_v1 = vld [vmem:[%s1275_s0 + $0xb8] sm:$0xff] }
  0x1e   :  { %615 = vmatpush.bf16.msra.mxu3 %v890_v2 }
  0x21   :  { %542 = vmatpush.bf16.msra.mxu2 %v881_v3 }
  0x22   :  { %616 = vmatpush.bf16.msra.mxu3 %v889_v4 }
  0x25   :  { %543 = vmatpush.bf16.msra.mxu2 %v880_v5 }
  0x26   :  { %617 = vmatpush.bf16.msra.mxu3 %v888_v6 }
  0x29   :  { %544 = vmatpush.bf16.msra.mxu2 %v879_v7 }
  0x2a   :  { %618 = vmatpush.bf16.msra.mxu3 %v887_v8 }
  0x2b   :  { %778 = vmatmul.msk.bf16.gmra.mxu0 %vm139_vm0, %v49_v41 }
  0x2c   :  { %791 = vmatmul.msk.bf16.gmra.mxu1 %vm139_vm0, %v49_v41 }
  0x3b   :  { %779 = vmatmul.msk.bf16.gmra.mxu0 %vm139_vm0, %v50_v44 }
  0x3c   :  { %792 = vmatmul.msk.bf16.gmra.mxu1 %vm139_vm0, %v50_v44 }
  0x4b   :  { %780 = vmatmul.msk.bf16.gmra.mxu0 %vm139_vm0, %v51_v47 }
  0x4c   :  { %793 = vmatmul.msk.bf16.gmra.mxu1 %vm139_vm0, %v51_v47  ;;  %v42_v47 = vld [vmem:[%s1275_s0 + $0xa0] sm:$0xff] }
  0x4d   :  { %v58_v51 = vpack.c.bf16 %v43_v48, %v42_v47 }
  0x5b   :  { %781 = vmatmul.msk.bf16.gmra.mxu0 %vm139_vm0, %v52_v50 }
  0x5c   :  { %794 = vmatmul.msk.bf16.gmra.mxu1 %vm139_vm0, %v52_v50 }
  0x6b   :  { %782 = vmatmul.msk.bf16.gmra.mxu0 %vm139_vm0, %v53_v55 }
  0x6c   :  { %795 = vmatmul.msk.bf16.gmra.mxu1 %vm139_vm0, %v53_v55 }
  0x7b   :  { %783 = vmatmul.msk.bf16.gmra.mxu0 %vm139_vm0, %v54_v0 }
  0x7c   :  { %796 = vmatmul.msk.bf16.gmra.mxu1 %vm139_vm0, %v54_v0  ;;  %v44_v0 = vld [vmem:[%s1275_s0 + $0xb0] sm:$0xff] }
  0x7d   :  { %v59_v4 = vpack.c.bf16 %v45_v1, %v44_v0 }
  0x8b   :  { %784 = vmatmul.msk.bf16.gmra.mxu0 %vm139_vm0, %v55_v11 }
  0x8c   :  { %797 = vmatmul.msk.bf16.gmra.mxu1 %vm139_vm0, %v55_v11 }
  0x98   :  { %v188_v16 = vpop.f32.mrf.mxu0 }
  0x99   :  { %v262_v17 = vpop.f32.mrf.mxu1  ;;  %v189_v20 = vadd.f32 %v188_v16, %v1151_v18 }
  0x9a   :  { %v263_v21 = vadd.f32 %v262_v17, %v1154_v19  ;;  %v46_v17 = vld [vmem:[%s1275_s0 + $0xc0] sm:$0xff] }
  0x9b   :  { %785 = vmatmul.msk.bf16.gmra.mxu0 %vm139_vm0, %v56_v14  ;;  %v327_v26 = vmax.f32 %v189_v20, 0.0  ;;  %v47_v20 = vld [vmem:[%s1275_s0 + $0xc8] sm:$0xff] }
  0x9c   :  { %798 = vmatmul.msk.bf16.gmra.mxu1 %vm139_vm0, %v56_v14  ;;  %v328_v28 = vmax.f32 %v263_v21, 0.0 }
  0xa0   :  { %v190_v22 = vpop.f32.mrf.mxu0 }
  0xa1   :  { %v191_v23 = vadd.f32 %v190_v22, %v1151_v18  ;;  %v264_v24 = vpop.f32.mrf.mxu1 }
  0xa2   :  { %v265_v25 = vadd.f32 %v264_v24, %v1154_v19 }
  0xa3   :  { %v329_v27 = vmax.f32 %v191_v23, 0.0  ;;  %v60_v23 = vpack.c.bf16 %v47_v20, %v46_v17 }
  0xa4   :  { %v330_v29 = vmax.f32 %v265_v25, 0.0 }
  0xa5   :  { %v379_v32 = vpack.c.bf16 %v329_v27, %v327_v26 }
  0xa6   :  { %v380_v33 = vpack.c.bf16 %v330_v29, %v328_v28 }
  0xa7   :  { %545 = vmatmul.bf16.vlgmr.msra.gmra.mxu2 %v379_v32 }
  0xa8   :  { %619 = vmatmul.bf16.vlgmr.msra.gmra.mxu3 %v380_v33  ;;  %v193_v35 = vpop.f32.mrf.mxu0 }
  0xa9   :  { %v267_v36 = vpop.f32.mrf.mxu1  ;;  %v194_v37 = vadd.f32 %v193_v35, %v1151_v18 }
  0xaa   :  { %v268_v38 = vadd.f32 %v267_v36, %v1154_v19 }
  0xab   :  { %786 = vmatmul.msk.bf16.gmra.mxu0 %vm139_vm0, %v57_v34  ;;  %v331_v43 = vmax.f32 %v194_v37, 0.0 }
  0xac   :  { %799 = vmatmul.msk.bf16.gmra.mxu1 %vm139_vm0, %v57_v34  ;;  %v332_v45 = vmax.f32 %v268_v38, 0.0 }
  0xb0   :  { %v195_v39 = vpop.f32.mrf.mxu0 }
  0xb1   :  { %v196_v40 = vadd.f32 %v195_v39, %v1151_v18  ;;  %v269_v41 = vpop.f32.mrf.mxu1 }
  0xb2   :  { %v270_v42 = vadd.f32 %v269_v41, %v1154_v19 }
  0xb3   :  { %v333_v44 = vmax.f32 %v196_v40, 0.0 }
  0xb4   :  { %v334_v46 = vmax.f32 %v270_v42, 0.0 }
  0xb5   :  { %v381_v49 = vpack.c.bf16 %v333_v44, %v331_v43 }
  0xb6   :  { %v382_v50 = vpack.c.bf16 %v334_v46, %v332_v45 }
  0xb7   :  { %550 = vmatmul.bf16.gmra.mxu2 %v381_v49 }
  0xb8   :  { %624 = vmatmul.bf16.gmra.mxu3 %v382_v50  ;;  %v198_v52 = vpop.f32.mrf.mxu0 }
  0xb9   :  { %v272_v53 = vpop.f32.mrf.mxu1  ;;  %v199_v54 = vadd.f32 %v198_v52, %v1151_v18 }
  0xba   :  { %v273_v55 = vadd.f32 %v272_v53, %v1154_v19 }
  0xbb   :  { %787 = vmatmul.msk.bf16.gmra.mxu0 %vm139_vm0, %v58_v51  ;;  %v335_v60 = vmax.f32 %v199_v54, 0.0 }
  0xbc   :  { %800 = vmatmul.msk.bf16.gmra.mxu1 %vm139_vm0, %v58_v51  ;;  %v336_v62 = vmax.f32 %v273_v55, 0.0 }
  0xc0   :  { %v200_v56 = vpop.f32.mrf.mxu0 }
  0xc1   :  { %v201_v57 = vadd.f32 %v200_v56, %v1151_v18  ;;  %v274_v58 = vpop.f32.mrf.mxu1 }
  0xc2   :  { %v275_v59 = vadd.f32 %v274_v58, %v1154_v19 }
  0xc3   :  { %v337_v61 = vmax.f32 %v201_v57, 0.0 }
  0xc4   :  { %v338_v63 = vmax.f32 %v275_v59, 0.0 }
  0xc5   :  { %v383_v2 = vpack.c.bf16 %v337_v61, %v335_v60 }
  0xc6   :  { %v384_v3 = vpack.c.bf16 %v338_v63, %v336_v62 }
  0xc7   :  { %555 = vmatmul.bf16.gmra.mxu2 %v383_v2 }
  0xc8   :  { %629 = vmatmul.bf16.gmra.mxu3 %v384_v3  ;;  %v203_v5 = vpop.f32.mrf.mxu0 }
  0xc9   :  { %v277_v6 = vpop.f32.mrf.mxu1  ;;  %v204_v7 = vadd.f32 %v203_v5, %v1151_v18 }
  0xca   :  { %v278_v8 = vadd.f32 %v277_v6, %v1154_v19 }
  0xcb   :  { %788 = vmatmul.msk.bf16.gmra.mxu0 %vm139_vm0, %v59_v4  ;;  %v339_v13 = vmax.f32 %v204_v7, 0.0 }
  0xcc   :  { %801 = vmatmul.msk.bf16.gmra.mxu1 %vm139_vm0, %v59_v4  ;;  %v340_v15 = vmax.f32 %v278_v8, 0.0 }
  0xd0   :  { %v205_v9 = vpop.f32.mrf.mxu0 }
  0xd1   :  { %v206_v10 = vadd.f32 %v205_v9, %v1151_v18  ;;  %v279_v11 = vpop.f32.mrf.mxu1 }
  0xd2   :  { %v280_v12 = vadd.f32 %v279_v11, %v1154_v19 }
  0xd3   :  { %v341_v14 = vmax.f32 %v206_v10, 0.0 }
  0xd4   :  { %v342_v16 = vmax.f32 %v280_v12, 0.0 }
  0xd5   :  { %v385_v21 = vpack.c.bf16 %v341_v14, %v339_v13 }
  0xd6   :  { %v386_v22 = vpack.c.bf16 %v342_v16, %v340_v15 }
  0xd7   :  { %560 = vmatmul.bf16.gmra.mxu2 %v385_v21 }
  0xd8   :  { %634 = vmatmul.bf16.gmra.mxu3 %v386_v22  ;;  %v208_v24 = vpop.f32.mrf.mxu0 }
  0xd9   :  { %v282_v25 = vpop.f32.mrf.mxu1  ;;  %v209_v26 = vadd.f32 %v208_v24, %v1151_v18 }
  0xda   :  { %v283_v27 = vadd.f32 %v282_v25, %v1154_v19 }
  0xdb   :  { %789 = vmatmul.msk.bf16.gmra.mxu0 %vm139_vm0, %v60_v23  ;;  %v343_v32 = vmax.f32 %v209_v26, 0.0 }
  0xdc   :  { %802 = vmatmul.msk.bf16.gmra.mxu1 %vm139_vm0, %v60_v23  ;;  %v344_v34 = vmax.f32 %v283_v27, 0.0 }
  0xe0   :  { %v210_v28 = vpop.f32.mrf.mxu0 }
  0xe1   :  { %v211_v29 = vadd.f32 %v210_v28, %v1151_v18  ;;  %v284_v30 = vpop.f32.mrf.mxu1 }
  0xe2   :  { %v285_v31 = vadd.f32 %v284_v30, %v1154_v19 }
  0xe3   :  { %v345_v33 = vmax.f32 %v211_v29, 0.0 }
  0xe4   :  { %v346_v35 = vmax.f32 %v285_v31, 0.0 }
  0xe5   :  { %v387_v36 = vpack.c.bf16 %v345_v33, %v343_v32  ;;  %v1228_v32 = vld [vmem:[%s1279_s4] ss:$0 sm:$0xff] }
  0xe6   :  { %v388_v37 = vpack.c.bf16 %v346_v35, %v344_v34 }
  0xe7   :  { %565 = vmatmul.bf16.gmra.mxu2 %v387_v36 }
  0xe8   :  { %639 = vmatmul.bf16.gmra.mxu3 %v388_v37  ;;  %v213_v38 = vpop.f32.mrf.mxu0 }
  0xe9   :  { %v287_v39 = vpop.f32.mrf.mxu1  ;;  %v214_v40 = vadd.f32 %v213_v38, %v1151_v18 }
  0xea   :  { %v288_v41 = vadd.f32 %v287_v39, %v1154_v19 }
  0xeb   :  { %v347_v46 = vmax.f32 %v214_v40, 0.0 }
  0xec   :  { %v348_v48 = vmax.f32 %v288_v41, 0.0 }
  0xf0   :  { %v215_v42 = vpop.f32.mrf.mxu0 }
  0xf1   :  { %v216_v43 = vadd.f32 %v215_v42, %v1151_v18  ;;  %v289_v44 = vpop.f32.mrf.mxu1 }
  0xf2   :  { %v290_v45 = vadd.f32 %v289_v44, %v1154_v19 }
  0xf3   :  { %v349_v47 = vmax.f32 %v216_v43, 0.0 }
  0xf4   :  { %v350_v49 = vmax.f32 %v290_v45, 0.0 }
  0xf5   :  { %v389_v50 = vpack.c.bf16 %v349_v47, %v347_v46 }
  0xf6   :  { %v390_v51 = vpack.c.bf16 %v350_v49, %v348_v48 }
  0xf7   :  { %570 = vmatmul.bf16.gmra.mxu2 %v389_v50 }
  0xf8   :  { %644 = vmatmul.bf16.gmra.mxu3 %v390_v51  ;;  %v218_v52 = vpop.f32.mrf.mxu0 }
  0xf9   :  { %v292_v53 = vpop.f32.mrf.mxu1  ;;  %v219_v54 = vadd.f32 %v218_v52, %v1151_v18 }
  0xfa   :  { %v293_v55 = vadd.f32 %v292_v53, %v1154_v19 }
  0xfb   :  { %v351_v60 = vmax.f32 %v219_v54, 0.0 }
  0xfc   :  { %v352_v62 = vmax.f32 %v293_v55, 0.0 }
 0x100   :  { %v220_v56 = vpop.f32.mrf.mxu0 }
 0x101   :  { %v221_v57 = vadd.f32 %v220_v56, %v1151_v18  ;;  %v294_v58 = vpop.f32.mrf.mxu1 }
 0x102   :  { %v295_v59 = vadd.f32 %v294_v58, %v1154_v19 }
 0x103   :  { %v353_v61 = vmax.f32 %v221_v57, 0.0 }
 0x104   :  { %v354_v63 = vmax.f32 %v295_v59, 0.0 }
 0x105   :  { %v391_v0 = vpack.c.bf16 %v353_v61, %v351_v60 }
 0x106   :  { %v392_v1 = vpack.c.bf16 %v354_v63, %v352_v62 }
 0x107   :  { %575 = vmatmul.bf16.gmra.mxu2 %v391_v0 }
 0x108   :  { %649 = vmatmul.bf16.gmra.mxu3 %v392_v1  ;;  %v223_v2 = vpop.f32.mrf.mxu0 }
 0x109   :  { %v297_v3 = vpop.f32.mrf.mxu1  ;;  %v224_v4 = vadd.f32 %v223_v2, %v1151_v18 }
 0x10a   :  { %v298_v5 = vadd.f32 %v297_v3, %v1154_v19 }
 0x10b   :  { %v355_v10 = vmax.f32 %v224_v4, 0.0 }
 0x10c   :  { %v356_v12 = vmax.f32 %v298_v5, 0.0 }
 0x110   :  { %v225_v6 = vpop.f32.mrf.mxu0 }
 0x111   :  { %v226_v7 = vadd.f32 %v225_v6, %v1151_v18  ;;  %v299_v8 = vpop.f32.mrf.mxu1 }
 0x112   :  { %v300_v9 = vadd.f32 %v299_v8, %v1154_v19 }
 0x113   :  { %v357_v11 = vmax.f32 %v226_v7, 0.0 }
 0x114   :  { %v358_v13 = vmax.f32 %v300_v9, 0.0 }
 0x115   :  { %v393_v14 = vpack.c.bf16 %v357_v11, %v355_v10 }
 0x116   :  { %v394_v15 = vpack.c.bf16 %v358_v13, %v356_v12 }
 0x117   :  { %580 = vmatmul.bf16.gmra.mxu2 %v393_v14 }
 0x118   :  { %654 = vmatmul.bf16.gmra.mxu3 %v394_v15  ;;  %v228_v16 = vpop.f32.mrf.mxu0 }
 0x119   :  { %v302_v17 = vpop.f32.mrf.mxu1  ;;  %v229_v20 = vadd.f32 %v228_v16, %v1151_v18 }
 0x11a   :  { %v303_v21 = vadd.f32 %v302_v17, %v1154_v19 }
 0x11b   :  { %v359_v26 = vmax.f32 %v229_v20, 0.0 }
 0x11c   :  { %v360_v28 = vmax.f32 %v303_v21, 0.0 }
 0x120   :  { %v230_v22 = vpop.f32.mrf.mxu0 }
 0x121   :  { %v231_v23 = vadd.f32 %v230_v22, %v1151_v18  ;;  %v304_v24 = vpop.f32.mrf.mxu1 }
 0x122   :  { %v305_v25 = vadd.f32 %v304_v24, %v1154_v19 }
 0x123   :  { %v361_v27 = vmax.f32 %v231_v23, 0.0 }
 0x124   :  { %v362_v29 = vmax.f32 %v305_v25, 0.0 }
 0x125   :  { %v395_v30 = vpack.c.bf16 %v361_v27, %v359_v26 }
 0x126   :  { %v396_v31 = vpack.c.bf16 %v362_v29, %v360_v28 }
 0x127   :  { %585 = vmatmul.bf16.gmra.mxu2 %v395_v30 }
 0x128   :  { %659 = vmatmul.bf16.gmra.mxu3 %v396_v31  ;;  %v233_v33 = vpop.f32.mrf.mxu0 }
 0x129   :  { %v307_v34 = vpop.f32.mrf.mxu1  ;;  %v234_v39 = vadd.f32 %v233_v33, %v1151_v18 }
 0x12a   :  { %v546_v35 = vpop.f32.mrf.mxu2  ;;  %v308_v40 = vadd.f32 %v307_v34, %v1154_v19 }
 0x12b   :  { %v547_v36 = vadd.f32 %v1228_v32, %v546_v35  ;;  %v620_v37 = vpop.f32.mrf.mxu3  ;;  %v363_v46 = vmax.f32 %v234_v39, 0.0 }
 0x12c   :  { %v364_v50 = vmax.f32 %v308_v40, 0.0 }
 0x12d   :  { %v621_v38 = vadd.f32 %v620_v37, %v547_v36 }
 0x12f   :  { %685 = vst [vmem:[#allocation2] sm:$0xff] %v621_v38 }
 0x130   :  { %v235_v41 = vpop.f32.mrf.mxu0 }
 0x131   :  { %v236_v42 = vadd.f32 %v235_v41, %v1151_v18  ;;  %v309_v43 = vpop.f32.mrf.mxu1 }
 0x132   :  { %v310_v44 = vadd.f32 %v309_v43, %v1154_v19  ;;  %v548_v45 = vpop.f32.mrf.mxu2 }
 0x133   :  { %v365_v47 = vmax.f32 %v236_v42, 0.0  ;;  %v549_v48 = vadd.f32 %v1228_v32, %v548_v45  ;;  %v622_v49 = vpop.f32.mrf.mxu3 }
 0x134   :  { %v366_v51 = vmax.f32 %v310_v44, 0.0 }
 0x135   :  { %v623_v52 = vadd.f32 %v622_v49, %v549_v48  ;;  %v397_v53 = vpack.c.bf16 %v365_v47, %v363_v46 }
 0x136   :  { %v398_v54 = vpack.c.bf16 %v366_v51, %v364_v50 }
 0x137   :  { %686 = vst [vmem:[#allocation2 + $0x8] sm:$0xff] %v623_v52  ;;  %590 = vmatmul.bf16.gmra.mxu2 %v397_v53 }
 0x138   :  { %664 = vmatmul.bf16.gmra.mxu3 %v398_v54  ;;  %v238_v55 = vpop.f32.mrf.mxu0 }
 0x139   :  { %v312_v56 = vpop.f32.mrf.mxu1  ;;  %v239_v61 = vadd.f32 %v238_v55, %v1151_v18 }
 0x13a   :  { %v551_v57 = vpop.f32.mrf.mxu2  ;;  %v313_v62 = vadd.f32 %v312_v56, %v1154_v19 }
 0x13b   :  { %v552_v58 = vadd.f32 %v1228_v32, %v551_v57  ;;  %v625_v59 = vpop.f32.mrf.mxu3  ;;  %v367_v4 = vmax.f32 %v239_v61, 0.0 }
 0x13c   :  { %v368_v8 = vmax.f32 %v313_v62, 0.0 }
 0x13d   :  { %v626_v60 = vadd.f32 %v625_v59, %v552_v58 }
 0x13f   :  { %687 = vst [vmem:[#allocation2 + $0x10] sm:$0xff] %v626_v60 }
 0x140   :  { %v240_v63 = vpop.f32.mrf.mxu0 }
 0x141   :  { %v241_v0 = vadd.f32 %v240_v63, %v1151_v18  ;;  %v314_v1 = vpop.f32.mrf.mxu1 }
 0x142   :  { %v315_v2 = vadd.f32 %v314_v1, %v1154_v19  ;;  %v553_v3 = vpop.f32.mrf.mxu2 }
 0x143   :  { %v369_v5 = vmax.f32 %v241_v0, 0.0  ;;  %v554_v6 = vadd.f32 %v1228_v32, %v553_v3  ;;  %v627_v7 = vpop.f32.mrf.mxu3 }
 0x144   :  { %v370_v9 = vmax.f32 %v315_v2, 0.0 }
 0x145   :  { %v628_v10 = vadd.f32 %v627_v7, %v554_v6  ;;  %v399_v11 = vpack.c.bf16 %v369_v5, %v367_v4 }
 0x146   :  { %v400_v12 = vpack.c.bf16 %v370_v9, %v368_v8 }
 0x147   :  { %688 = vst [vmem:[#allocation2 + $0x18] sm:$0xff] %v628_v10  ;;  %595 = vmatmul.bf16.gmra.mxu2 %v399_v11 }
 0x148   :  { %669 = vmatmul.bf16.gmra.mxu3 %v400_v12  ;;  %v243_v13 = vpop.f32.mrf.mxu0 }
 0x149   :  { %v317_v14 = vpop.f32.mrf.mxu1  ;;  %v244_v21 = vadd.f32 %v243_v13, %v1151_v18 }
 0x14a   :  { %v556_v15 = vpop.f32.mrf.mxu2  ;;  %v318_v22 = vadd.f32 %v317_v14, %v1154_v19 }
 0x14b   :  { %v557_v16 = vadd.f32 %v1228_v32, %v556_v15  ;;  %v630_v17 = vpop.f32.mrf.mxu3  ;;  %v371_v28 = vmax.f32 %v244_v21, 0.0 }
 0x14c   :  { %v372_v33 = vmax.f32 %v318_v22, 0.0 }
 0x14d   :  { %v631_v20 = vadd.f32 %v630_v17, %v557_v16 }
 0x14f   :  { %689 = vst [vmem:[#allocation2 + $0x20] sm:$0xff] %v631_v20 }
 0x150   :  { %v245_v23 = vpop.f32.mrf.mxu0 }
 0x151   :  { %v246_v24 = vadd.f32 %v245_v23, %v1151_v18  ;;  %v319_v25 = vpop.f32.mrf.mxu1 }
 0x152   :  { %v320_v26 = vadd.f32 %v319_v25, %v1154_v19  ;;  %v558_v27 = vpop.f32.mrf.mxu2 }
 0x153   :  { %v373_v29 = vmax.f32 %v246_v24, 0.0  ;;  %v559_v30 = vadd.f32 %v1228_v32, %v558_v27  ;;  %v632_v31 = vpop.f32.mrf.mxu3 }
 0x154   :  { %v374_v34 = vmax.f32 %v320_v26, 0.0 }
 0x155   :  { %v633_v35 = vadd.f32 %v632_v31, %v559_v30  ;;  %v401_v36 = vpack.c.bf16 %v373_v29, %v371_v28 }
 0x156   :  { %v402_v37 = vpack.c.bf16 %v374_v34, %v372_v33 }
 0x157   :  { %690 = vst [vmem:[#allocation2 + $0x28] sm:$0xff] %v633_v35  ;;  %600 = vmatmul.bf16.gmra.mxu2 %v401_v36 }
 0x158   :  { %674 = vmatmul.bf16.gmra.mxu3 %v402_v37  ;;  %v248_v38 = vpop.f32.mrf.mxu0 }
 0x159   :  { %v322_v39 = vpop.f32.mrf.mxu1  ;;  %v249_v44 = vadd.f32 %v248_v38, %v1151_v18 }
 0x15a   :  { %v561_v40 = vpop.f32.mrf.mxu2  ;;  %v323_v45 = vadd.f32 %v322_v39, %v1154_v19 }
 0x15b   :  { %v562_v41 = vadd.f32 %v1228_v32, %v561_v40  ;;  %v635_v42 = vpop.f32.mrf.mxu3  ;;  %v375_v51 = vmax.f32 %v249_v44, 0.0 }
 0x15c   :  { %v376_v55 = vmax.f32 %v323_v45, 0.0 }
 0x15d   :  { %v636_v43 = vadd.f32 %v635_v42, %v562_v41 }
 0x15f   :  { %691 = vst [vmem:[#allocation2 + $0x30] sm:$0xff] %v636_v43 }
 0x160   :  { %v250_v46 = vpop.f32.mrf.mxu0 }
 0x161   :  { %v251_v47 = vadd.f32 %v250_v46, %v1151_v18  ;;  %v324_v48 = vpop.f32.mrf.mxu1 }
 0x162   :  { %v325_v49 = vadd.f32 %v324_v48, %v1154_v19  ;;  %v563_v50 = vpop.f32.mrf.mxu2 }
 0x163   :  { %v377_v52 = vmax.f32 %v251_v47, 0.0  ;;  %v564_v53 = vadd.f32 %v1228_v32, %v563_v50  ;;  %v637_v54 = vpop.f32.mrf.mxu3 }
 0x164   :  { %v378_v56 = vmax.f32 %v325_v49, 0.0 }
 0x165   :  { %v403_v57 = vpack.c.bf16 %v377_v52, %v375_v51  ;;  %v638_v58 = vadd.f32 %v637_v54, %v564_v53 }
 0x166   :  { %v404_v59 = vpack.c.bf16 %v378_v56, %v376_v55 }
 0x167   :  { %692 = vst [vmem:[#allocation2 + $0x38] sm:$0xff] %v638_v58  ;;  %605 = vmatmul.bf16.gmra.mxu2 %v403_v57 }
 0x168   :  { %679 = vmatmul.bf16.gmra.mxu3 %v404_v59 }
 0x16a   :  { %v566_v60 = vpop.f32.mrf.mxu2 }
 0x16b   :  { %v567_v18 = vadd.f32 %v1228_v32, %v566_v60  ;;  %v640_v61 = vpop.f32.mrf.mxu3 }
 0x16d   :  { %v641_v62 = vadd.f32 %v640_v61, %v567_v18 }
 0x16f   :  { %693 = vst [vmem:[#allocation2 + $0x40] sm:$0xff] %v641_v62 }
 0x172   :  { %v568_v19 = vpop.f32.mrf.mxu2 }
 0x173   :  { %v569_v63 = vadd.f32 %v1228_v32, %v568_v19  ;;  %v642_v0 = vpop.f32.mrf.mxu3 }
 0x175   :  { %v643_v1 = vadd.f32 %v642_v0, %v569_v63 }
 0x177   :  { %694 = vst [vmem:[#allocation2 + $0x48] sm:$0xff] %v643_v1 }
 0x17a   :  { %v571_v2 = vpop.f32.mrf.mxu2 }
 0x17b   :  { %v572_v3 = vadd.f32 %v1228_v32, %v571_v2  ;;  %v645_v4 = vpop.f32.mrf.mxu3 }
 0x17d   :  { %v646_v5 = vadd.f32 %v645_v4, %v572_v3 }
 0x17f   :  { %695 = vst [vmem:[#allocation2 + $0x50] sm:$0xff] %v646_v5 }
 0x182   :  { %v573_v6 = vpop.f32.mrf.mxu2 }
 0x183   :  { %v574_v7 = vadd.f32 %v1228_v32, %v573_v6  ;;  %v647_v8 = vpop.f32.mrf.mxu3 }
 0x185   :  { %v648_v9 = vadd.f32 %v647_v8, %v574_v7 }
 0x187   :  { %696 = vst [vmem:[#allocation2 + $0x58] sm:$0xff] %v648_v9 }
 0x18a   :  { %v576_v10 = vpop.f32.mrf.mxu2 }
 0x18b   :  { %v577_v11 = vadd.f32 %v1228_v32, %v576_v10  ;;  %v650_v12 = vpop.f32.mrf.mxu3 }
 0x18d   :  { %v651_v13 = vadd.f32 %v650_v12, %v577_v11 }
 0x18f   :  { %697 = vst [vmem:[#allocation2 + $0x60] sm:$0xff] %v651_v13 }
 0x192   :  { %v578_v14 = vpop.f32.mrf.mxu2 }
 0x193   :  { %v579_v15 = vadd.f32 %v1228_v32, %v578_v14  ;;  %v652_v16 = vpop.f32.mrf.mxu3 }
 0x195   :  { %v653_v17 = vadd.f32 %v652_v16, %v579_v15 }
 0x197   :  { %698 = vst [vmem:[#allocation2 + $0x68] sm:$0xff] %v653_v17 }
 0x19a   :  { %v581_v20 = vpop.f32.mrf.mxu2 }
 0x19b   :  { %v582_v21 = vadd.f32 %v1228_v32, %v581_v20  ;;  %v655_v22 = vpop.f32.mrf.mxu3 }
 0x19d   :  { %v656_v23 = vadd.f32 %v655_v22, %v582_v21 }
 0x19f   :  { %699 = vst [vmem:[#allocation2 + $0x70] sm:$0xff] %v656_v23 }
 0x1a2   :  { %v583_v24 = vpop.f32.mrf.mxu2 }
 0x1a3   :  { %v584_v25 = vadd.f32 %v1228_v32, %v583_v24  ;;  %v657_v26 = vpop.f32.mrf.mxu3 }
 0x1a5   :  { %v658_v27 = vadd.f32 %v657_v26, %v584_v25 }
 0x1a7   :  { %700 = vst [vmem:[#allocation2 + $0x78] sm:$0xff] %v658_v27 }
 0x1aa   :  { %v586_v28 = vpop.f32.mrf.mxu2 }
 0x1ab   :  { %v587_v29 = vadd.f32 %v1228_v32, %v586_v28  ;;  %v660_v30 = vpop.f32.mrf.mxu3 }
 0x1ad   :  { %v661_v31 = vadd.f32 %v660_v30, %v587_v29 }
 0x1af   :  { %701 = vst [vmem:[#allocation2 + $0x80] sm:$0xff] %v661_v31 }
 0x1b2   :  { %v588_v33 = vpop.f32.mrf.mxu2 }
 0x1b3   :  { %v589_v34 = vadd.f32 %v1228_v32, %v588_v33  ;;  %v662_v35 = vpop.f32.mrf.mxu3 }
 0x1b5   :  { %v663_v36 = vadd.f32 %v662_v35, %v589_v34 }
 0x1b7   :  { %702 = vst [vmem:[#allocation2 + $0x88] sm:$0xff] %v663_v36 }
 0x1ba   :  { %v591_v37 = vpop.f32.mrf.mxu2 }
 0x1bb   :  { %v592_v38 = vadd.f32 %v1228_v32, %v591_v37  ;;  %v665_v39 = vpop.f32.mrf.mxu3 }
 0x1bd   :  { %v666_v40 = vadd.f32 %v665_v39, %v592_v38 }
 0x1bf   :  { %703 = vst [vmem:[#allocation2 + $0x90] sm:$0xff] %v666_v40 }
 0x1c2   :  { %v593_v41 = vpop.f32.mrf.mxu2 }
 0x1c3   :  { %v594_v42 = vadd.f32 %v1228_v32, %v593_v41  ;;  %v667_v43 = vpop.f32.mrf.mxu3 }
 0x1c5   :  { %v668_v44 = vadd.f32 %v667_v43, %v594_v42 }
 0x1c7   :  { %704 = vst [vmem:[#allocation2 + $0x98] sm:$0xff] %v668_v44 }
 0x1ca   :  { %v596_v45 = vpop.f32.mrf.mxu2 }
 0x1cb   :  { %v597_v46 = vadd.f32 %v1228_v32, %v596_v45  ;;  %v670_v47 = vpop.f32.mrf.mxu3 }
 0x1cd   :  { %v671_v48 = vadd.f32 %v670_v47, %v597_v46 }
 0x1cf   :  { %705 = vst [vmem:[#allocation2 + $0xa0] sm:$0xff] %v671_v48 }
 0x1d2   :  { %v598_v49 = vpop.f32.mrf.mxu2 }
 0x1d3   :  { %v599_v50 = vadd.f32 %v1228_v32, %v598_v49  ;;  %v672_v51 = vpop.f32.mrf.mxu3 }
 0x1d5   :  { %v673_v52 = vadd.f32 %v672_v51, %v599_v50 }
 0x1d7   :  { %706 = vst [vmem:[#allocation2 + $0xa8] sm:$0xff] %v673_v52 }
 0x1da   :  { %v601_v53 = vpop.f32.mrf.mxu2 }
 0x1db   :  { %v602_v54 = vadd.f32 %v1228_v32, %v601_v53  ;;  %v675_v55 = vpop.f32.mrf.mxu3 }
 0x1dd   :  { %v676_v56 = vadd.f32 %v675_v55, %v602_v54 }
 0x1df   :  { %707 = vst [vmem:[#allocation2 + $0xb0] sm:$0xff] %v676_v56 }
 0x1e2   :  { %v603_v57 = vpop.f32.mrf.mxu2 }
 0x1e3   :  { %v604_v58 = vadd.f32 %v1228_v32, %v603_v57  ;;  %v677_v59 = vpop.f32.mrf.mxu3 }
 0x1e5   :  { %v678_v60 = vadd.f32 %v677_v59, %v604_v58 }
 0x1e7   :  { %708 = vst [vmem:[#allocation2 + $0xb8] sm:$0xff] %v678_v60 }
 0x1ea   :  { %v606_v18 = vpop.f32.mrf.mxu2 }
 0x1eb   :  { %v607_v61 = vadd.f32 %v1228_v32, %v606_v18  ;;  %v680_v62 = vpop.f32.mrf.mxu3 }
 0x1ed   :  { %v681_v19 = vadd.f32 %v680_v62, %v607_v61 }
 0x1ef   :  { %709 = vst [vmem:[#allocation2 + $0xc0] sm:$0xff] %v681_v19 }
 0x1f2   :  { %v608_v63 = vpop.f32.mrf.mxu2 }
 0x1f3   :  { %v609_v0 = vadd.f32 %v1228_v32, %v608_v63  ;;  %v682_v1 = vpop.f32.mrf.mxu3 }
 0x1f5   :  { %v683_v2 = vadd.f32 %v682_v1, %v609_v0 }
 0x1f7   :  { %710 = vst [vmem:[#allocation2 + $0xc8] sm:$0xff] %v683_v2 }
 0x1f8   :  { %714 = vsyncadd [#allocation3], 128  ;;  %s717_s23 = sshll.u32 %s1280_s5, 4  ;;  %s925_s24 = smov [#allocation2]   ;;  %s718_s23 = int_to_ptr.hbm [resolvable:$true] %s717_s23 }
 0x1f9   :  { %s715_s25 = sshll.u32 %s925_s24, 4  ;;  %s926_s26 = smov 128   ;;  %s716_s25 = int_to_ptr.vmem [resolvable:$true] %s715_s25 }
 0x1fa   :  { %s927_s27 = smov 8  }
 0x1fb   :  { %723 = dma.vmem_to_hbm [thread:$0]  %s716_s25, 3200, %s718_s23, [#allocation3], %s926_s26, %s926_s26, %s927_s27  }
 0x1fc   :  { %923 = dma.done.wait [#allocation3], 3328  }
 0x1fd   :  { %924 = vsyncadd [#allocation3], 4294963968 }
 0x1fe   :  { %728 = vsyncpa [#allocation3], 1 }

</bundles_post_ra>
